<compile_context>
chip_gen: v5e
topology: v5e:2x2
jax: 0.10.0
libtpu: 0.0.40
codegen_flags: <defaults>
</compile_context>

<pallas_src>
import math

import jax
import jax.numpy as jnp
import numpy as np
from jax.experimental import pallas as pl
from jax.experimental.pallas import tpu as pltpu

Q_BITS = 4
DECOMP_FACTOR = 8
CHUNK_SIZE = 256          # TENDER row-chunk size == matmul row tile
TN = 256                  # vocab (output) tile width
Q_MAX = float(2 ** (Q_BITS - 1) - 1)  # 7.0


# ----------------------------- Pallas kernels ------------------------------

def _act_qdq_kernel(x_ref, a_ref):
    """TENDER channel-decomposed quantize-dequantize of one 256-row chunk.

    x_ref : (CHUNK_SIZE, H) raw activations
    a_ref : (CHUNK_SIZE, H) bf16 qdq'd activations (MXU-ready)
    """
    x = x_ref[...].astype(jnp.float32)                            # (C, H)
    ax = jnp.abs(x)
    h_tmax = jnp.max(ax)                                          # chunk max
    h_cmax = jnp.max(ax, axis=0, keepdims=True)                   # (1, H)
    # thresholds t_i = h_tmax / 2**(DF-1-i); each column gets the smallest
    # bucket i with h_cmax <= t_i (last bucket catches everything larger),
    # exactly as the torch loop.
    col_thr = (h_tmax * (1.0 / 2.0 ** (DECOMP_FACTOR - 1))) * jnp.ones_like(h_cmax)
    for i in range(1, DECOMP_FACTOR):
        t_prev = h_tmax * (1.0 / 2.0 ** (DECOMP_FACTOR - i))      # t_{i-1}
        t_i = h_tmax * (1.0 / 2.0 ** (DECOMP_FACTOR - 1 - i))     # t_i
        col_thr = jnp.where(h_cmax > t_prev, t_i, col_thr)
    scale = col_thr * (1.0 / Q_MAX)                               # (1, H)
    scale_c = jnp.maximum(jnp.abs(scale), 1e-9)                   # sym_quant clamp
    q = jnp.clip(jnp.round(x / scale_c), -(Q_MAX + 1.0), Q_MAX)
    a_ref[...] = (q * scale).astype(a_ref.dtype)                  # sym_dequant


def _lmhead_matmul_kernel(a_ref, w_ref, o_ref):
    """Fused per-vocab-row weight qdq + A @ W^T for one (CHUNK, TN) logits tile.

    a_ref : (CHUNK_SIZE, H) bf16 qdq'd activation chunk
    w_ref : (TN, H)         raw weight tile (vocab rows x hidden, full H)
    o_ref : (CHUNK_SIZE, TN) logits tile
    """
    # Per-vocab-row 4-bit scale computed in-kernel (lane reduce -> XLU, hidden
    # behind the MXU); no separate scale pass, weight read from HBM only once.
    w = w_ref[...].astype(jnp.float32)                            # (TN, H)
    ws = jnp.max(jnp.abs(w), axis=-1, keepdims=True) * (1.0 / Q_MAX)   # (TN, 1)
    ws_c = jnp.maximum(jnp.abs(ws), 1e-9)
    wq = jnp.clip(jnp.round(w / ws_c), -(Q_MAX + 1.0), Q_MAX)
    w_dq = (wq * ws).astype(jnp.bfloat16)                         # (TN, H)

    # A @ W^T : contract the hidden dim of both operands, no materialized
    # transpose; bf16 operands, f32 accumulation.
    acc = jax.lax.dot_general(
        a_ref[...], w_dq,
        dimension_numbers=(((1,), (1,)), ((), ())),
        preferred_element_type=jnp.float32,
    )
    o_ref[...] = acc.astype(o_ref.dtype)


# -------------------------------- wrapper -----------------------------------

def lm_head_tender(hidden_states, lm_weight):
    dtype = hidden_states.dtype
    bsz, tgt_len, H = hidden_states.shape
    V = lm_weight.shape[0]

    # --- pad vocab to a multiple of TN so weight tiles are always (TN, H) ---
    v_blocks = -(-V // TN)
    V_pad = v_blocks * TN
    w = lm_weight if V_pad == V else jnp.pad(lm_weight, ((0, V_pad - V), (0, 0)))

    # --- pad activations to whole 256-row chunks (zeros, matches torch) ---
    n_rows = bsz * tgt_len
    chunks = -(-n_rows // CHUNK_SIZE)
    padded_rows = chunks * CHUNK_SIZE
    x = hidden_states.reshape(n_rows, H)
    if padded_rows != n_rows:
        x = jnp.pad(x, ((0, padded_rows - n_rows), (0, 0)))

    x_item = jnp.dtype(dtype).itemsize
    w_item = jnp.dtype(lm_weight.dtype).itemsize

    # --- 1) activation TENDER qdq (tiny vs. the vocab matmul) ---------------
    qdq_vmem = 2 * CHUNK_SIZE * H * x_item + 2 * CHUNK_SIZE * H * 2
    a_qdq = pl.pallas_call(
        _act_qdq_kernel,
        out_shape=jax.ShapeDtypeStruct((padded_rows, H), jnp.bfloat16),
        grid=(chunks,),
        in_specs=[pl.BlockSpec((CHUNK_SIZE, H), lambda i: (i, 0))],
        out_specs=pl.BlockSpec((CHUNK_SIZE, H), lambda i: (i, 0)),
        compiler_params=pltpu.CompilerParams(
            dimension_semantics=("parallel",),
            vmem_limit_bytes=int(min(max(2 * qdq_vmem, 32 << 20), 64 << 20))),
    )(x)

    # --- 2) fused weight qdq + matmul ---------------------------------------
    # Grid (vocab, chunk) with chunk innermost: weight tile DMA'd once per
    # vocab tile; bf16 qdq'd activations streamed (and elided when chunks==1).
    mm_vmem = (2 * CHUNK_SIZE * H * 2          # bf16 activation tile, dbl-buffered
               + 2 * TN * H * w_item           # weight tile, dbl-buffered
               + 2 * CHUNK_SIZE * TN * x_item) # output tile, dbl-buffered
    vmem_limit = int(min(max(2 * mm_vmem, 32 << 20), 64 << 20))
    # TODO(synk): for very large H (>= ~16384) on v7x (64 MiB VMEM), add an H
    # ("arbitrary") grid axis with an f32 accumulator instead of full-H blocks.

    logits_pad = pl.pallas_call(
        _lmhead_matmul_kernel,
        out_shape=jax.ShapeDtypeStruct((padded_rows, V_pad), dtype),
        grid=(v_blocks, chunks),
        in_specs=[pl.BlockSpec((CHUNK_SIZE, H), lambda j, i: (i, 0)),
                  pl.BlockSpec((TN, H), lambda j, i: (j, 0))],
        out_specs=pl.BlockSpec((CHUNK_SIZE, TN), lambda j, i: (i, j)),
        compiler_params=pltpu.CompilerParams(
            # Both axes independent (no persistent scratch), so megacore can
            # split the vocab axis even for single-chunk decode.
            dimension_semantics=("parallel", "parallel"),
            vmem_limit_bytes=vmem_limit),
    )(a_qdq, w)

    logits = logits_pad[:n_rows, :V].reshape(bsz, tgt_len, V)
    # TODO(synk): quant_out_bf16 path (mx.quantize_bfloat) is off by default and not ported.
    return logits


# -------------------------- pure-JAX reference ------------------------------

def lm_head_tender_ref(hidden_states, lm_weight):
    q_max = Q_MAX

    def sym_quant(fp, scale):
        scale = jnp.maximum(jnp.abs(scale), 1e-9)
        return jnp.clip(jnp.round(fp / scale), -(q_max + 1.0), q_max)

    scale_w = jnp.max(jnp.abs(lm_weight), axis=-1, keepdims=True) / q_max
    Wl = (sym_quant(lm_weight, scale_w) * scale_w).T

    bsz, tgt_len, H = hidden_states.shape
    x = hidden_states.reshape(bsz * tgt_len, H)
    chunks = int(math.ceil(x.shape[0] / CHUNK_SIZE))
    padded_rows = chunks * CHUNK_SIZE
    x = jnp.pad(x, ((0, padded_rows - x.shape[0]), (0, 0)))
    xc = x.reshape(chunks, CHUNK_SIZE, H)

    h_tmax = jnp.max(jnp.abs(xc), axis=(-1, -2))                        # (chunks,)
    thresholds = [(h_tmax / 2.0 ** (DECOMP_FACTOR - 1 - i))[:, None]
                  for i in range(DECOMP_FACTOR)]
    h_cmax = jnp.max(jnp.abs(xc), axis=-2)                              # (chunks, H)

    result = jnp.zeros_like(xc)
    for i in range(DECOMP_FACTOR):
        if i == 0:
            mask = h_cmax <= thresholds[i]
        elif i == DECOMP_FACTOR - 1:
            mask = h_cmax > thresholds[i - 1]
        else:
            mask = (thresholds[i - 1] < h_cmax) & (h_cmax <= thresholds[i])
        mask3 = mask[:, None, :]
        scale = thresholds[i][:, :, None] / q_max
        decomp_fp = jnp.where(mask3, xc, 0.0)
        result = result + sym_quant(decomp_fp, scale) * scale

    out = jnp.matmul(result, Wl, precision=jax.lax.Precision.HIGHEST)
    return out.reshape(padded_rows, -1)[:bsz * tgt_len].reshape(bsz, tgt_len, -1)


# --------------------------------- main --------------------------------------

if __name__ == "__main__":
    key = jax.random.PRNGKey(0)
    k1, k2 = jax.random.split(key)

    bsz, tgt_len, hidden_dim, vocab = 2, 300, 64, 256
    hidden_states = jax.random.normal(k1, (bsz, tgt_len, hidden_dim), jnp.float32)
    lm_weight = jax.random.normal(k2, (vocab, hidden_dim), jnp.float32) * 0.05

    logits = jax.block_until_ready(lm_head_tender(hidden_states, lm_weight))
    ref = lm_head_tender_ref(hidden_states, lm_weight)

    assert logits.shape == (bsz, tgt_len, vocab)
    # Tolerance loosened vs. the fp32/HIGHEST reference: the fused kernel feeds
    # the MXU bf16 operands (quantization decisions themselves stay in f32).
    np.testing.assert_allclose(np.asarray(logits), np.asarray(ref),
                               rtol=2e-2, atol=2e-2)
    print("KERNEL_OK")
</pallas_src>

<mosaic_0001>
module attributes {stable_mosaic.version = 11 : i64} {
  func.func @_act_qdq_kernel(%arg0: i32, %arg1: memref<256x64xf32, #tpu.memory_space<vmem>>, %arg2: memref<256x64xbf16, #tpu.memory_space<vmem>>) attributes {dimension_semantics = [#tpu.dimension_semantics<parallel>], iteration_bounds = array<i64: 3>, scalar_prefetch = 0 : i64, scratch_operands = 0 : i64, tpu.core_type = #tpu.core_type<tc>, window_params = [{transform_indices = @transform_0, window_bounds = array<i64: 256, 64>}, {transform_indices = @transform_1, window_bounds = array<i64: 256, 64>}]} {
    %c0 = arith.constant 0 : index
    %c0_0 = arith.constant 0 : index
    %0 = vector.load %arg1[%c0, %c0_0] : memref<256x64xf32, #tpu.memory_space<vmem>>, vector<256x64xf32>
    %1 = math.absf %0 : vector<256x64xf32>
    %2 = vector.shape_cast %1 : vector<256x64xf32> to vector<1x256x64xf32>
    %cst = arith.constant dense<0xFF800000> : vector<1xf32>
    %3 = vector.multi_reduction <maximumf>, %2, %cst [1, 2] : vector<1x256x64xf32> to vector<1xf32>
    %4 = vector.shape_cast %3 : vector<1xf32> to vector<1x1x1xf32>
    %5 = vector.extract %4[0, 0, 0] : f32 from vector<1x1x1xf32>
    %cst_1 = arith.constant dense<0xFF800000> : vector<64xf32>
    %6 = vector.multi_reduction <maximumf>, %1, %cst_1 [0] : vector<256x64xf32> to vector<64xf32>
    %7 = vector.shape_cast %6 : vector<64xf32> to vector<1x64xf32>
    %cst_2 = arith.constant 7.812500e-03 : f32
    %8 = arith.mulf %5, %cst_2 : f32
    %cst_3 = arith.constant 1.000000e+00 : f32
    %9 = vector.broadcast %cst_3 : f32 to vector<1x64xf32>
    %10 = vector.broadcast %8 : f32 to vector<1x64xf32>
    %11 = arith.mulf %10, %9 : vector<1x64xf32>
    %cst_4 = arith.constant 7.812500e-03 : f32
    %12 = arith.mulf %5, %cst_4 : f32
    %cst_5 = arith.constant 1.562500e-02 : f32
    %13 = arith.mulf %5, %cst_5 : f32
    %14 = vector.broadcast %12 : f32 to vector<1x64xf32>
    %15 = arith.cmpf ogt, %7, %14 : vector<1x64xf32>
    %16 = vector.broadcast %13 : f32 to vector<1x64xf32>
    %17 = arith.select %15, %16, %11 : vector<1x64xi1>, vector<1x64xf32>
    %cst_6 = arith.constant 1.562500e-02 : f32
    %18 = arith.mulf %5, %cst_6 : f32
    %cst_7 = arith.constant 3.125000e-02 : f32
    %19 = arith.mulf %5, %cst_7 : f32
    %20 = vector.broadcast %18 : f32 to vector<1x64xf32>
    %21 = arith.cmpf ogt, %7, %20 : vector<1x64xf32>
    %22 = vector.broadcast %19 : f32 to vector<1x64xf32>
    %23 = arith.select %21, %22, %17 : vector<1x64xi1>, vector<1x64xf32>
    %cst_8 = arith.constant 3.125000e-02 : f32
    %24 = arith.mulf %5, %cst_8 : f32
    %cst_9 = arith.constant 6.250000e-02 : f32
    %25 = arith.mulf %5, %cst_9 : f32
    %26 = vector.broadcast %24 : f32 to vector<1x64xf32>
    %27 = arith.cmpf ogt, %7, %26 : vector<1x64xf32>
    %28 = vector.broadcast %25 : f32 to vector<1x64xf32>
    %29 = arith.select %27, %28, %23 : vector<1x64xi1>, vector<1x64xf32>
    %cst_10 = arith.constant 6.250000e-02 : f32
    %30 = arith.mulf %5, %cst_10 : f32
    %cst_11 = arith.constant 1.250000e-01 : f32
    %31 = arith.mulf %5, %cst_11 : f32
    %32 = vector.broadcast %30 : f32 to vector<1x64xf32>
    %33 = arith.cmpf ogt, %7, %32 : vector<1x64xf32>
    %34 = vector.broadcast %31 : f32 to vector<1x64xf32>
    %35 = arith.select %33, %34, %29 : vector<1x64xi1>, vector<1x64xf32>
    %cst_12 = arith.constant 1.250000e-01 : f32
    %36 = arith.mulf %5, %cst_12 : f32
    %cst_13 = arith.constant 2.500000e-01 : f32
    %37 = arith.mulf %5, %cst_13 : f32
    %38 = vector.broadcast %36 : f32 to vector<1x64xf32>
    %39 = arith.cmpf ogt, %7, %38 : vector<1x64xf32>
    %40 = vector.broadcast %37 : f32 to vector<1x64xf32>
    %41 = arith.select %39, %40, %35 : vector<1x64xi1>, vector<1x64xf32>
    %cst_14 = arith.constant 2.500000e-01 : f32
    %42 = arith.mulf %5, %cst_14 : f32
    %cst_15 = arith.constant 5.000000e-01 : f32
    %43 = arith.mulf %5, %cst_15 : f32
    %44 = vector.broadcast %42 : f32 to vector<1x64xf32>
    %45 = arith.cmpf ogt, %7, %44 : vector<1x64xf32>
    %46 = vector.broadcast %43 : f32 to vector<1x64xf32>
    %47 = arith.select %45, %46, %41 : vector<1x64xi1>, vector<1x64xf32>
    %cst_16 = arith.constant 5.000000e-01 : f32
    %48 = arith.mulf %5, %cst_16 : f32
    %cst_17 = arith.constant 1.000000e+00 : f32
    %49 = arith.mulf %5, %cst_17 : f32
    %50 = vector.broadcast %48 : f32 to vector<1x64xf32>
    %51 = arith.cmpf ogt, %7, %50 : vector<1x64xf32>
    %52 = vector.broadcast %49 : f32 to vector<1x64xf32>
    %53 = arith.select %51, %52, %47 : vector<1x64xi1>, vector<1x64xf32>
    %cst_18 = arith.constant 0.142857149 : f32
    %54 = vector.broadcast %cst_18 : f32 to vector<1x64xf32>
    %55 = arith.mulf %53, %54 : vector<1x64xf32>
    %56 = math.absf %55 : vector<1x64xf32>
    %cst_19 = arith.constant 9.99999971E-10 : f32
    %57 = vector.broadcast %cst_19 : f32 to vector<1x64xf32>
    %58 = arith.maximumf %56, %57 : vector<1x64xf32>
    %59 = vector.broadcast %58 : vector<1x64xf32> to vector<256x64xf32>
    %60 = arith.divf %0, %59 : vector<256x64xf32>
    %61 = math.roundeven %60 : vector<256x64xf32>
    %cst_20 = arith.constant -8.000000e+00 : f32
    %cst_21 = arith.constant 7.000000e+00 : f32
    %62 = vector.broadcast %cst_20 : f32 to vector<256x64xf32>
    %63 = arith.maximumf %62, %61 : vector<256x64xf32>
    %64 = vector.broadcast %cst_21 : f32 to vector<256x64xf32>
    %65 = arith.minimumf %64, %63 : vector<256x64xf32>
    %66 = vector.broadcast %55 : vector<1x64xf32> to vector<256x64xf32>
    %67 = arith.mulf %65, %66 : vector<256x64xf32>
    %68 = arith.truncf %67 : vector<256x64xf32> to vector<256x64xbf16>
    %c0_22 = arith.constant 0 : index
    %c0_23 = arith.constant 0 : index
    %69 = vector.load %arg2[%c0_22, %c0_23] : memref<256x64xbf16, #tpu.memory_space<vmem>>, vector<256x64xbf16>
    tpu.vector_store %arg2[%c0_22, %c0_23], %68 {strides = array<i32>} : memref<256x64xbf16, #tpu.memory_space<vmem>>, vector<256x64xbf16>,
    return
  }
  func.func @transform_0(%arg0: i32) -> (i32, i32) {
    %c0_i32 = arith.constant 0 : i32
    %c0_i32_0 = arith.constant 0 : i32
    return %arg0, %c0_i32 : i32, i32
  }
  func.func @transform_1(%arg0: i32) -> (i32, i32) {
    %c0_i32 = arith.constant 0 : i32
    %c0_i32_0 = arith.constant 0 : i32
    return %arg0, %c0_i32 : i32, i32
  }
}

</mosaic_0001>

<bundles_post_ra>
// kernel: tpu_custom_call.1
= control target key start
LH: loop header
LB: loop body
LE: loop exit
PB: predicated region body
PF: predicated region fallthrough
CT: control target
= control target key end

     0   :  { %s887_s6 = smov 0   ;;  %s1843_s0 = inlined_call_operand.vmem [shape: f32[768,64], index: 0, kind: input, shape index: {}]   ;;  %s1844_s1 = inlined_call_operand.vmem [shape: bf16[768,64], index: 1, kind: output, shape index: {}]  }
   0x1 LB: > { %s590_s7 = sadd.s32 4294967295, %s875_s6   ;;  %p594_p0 = scmp.ge.s32.totalorder %s875_s6, 1  ;;  %s875_s6 = sphi %s887_s6, %s11_s6  }
   0x2   : > { %p88_p1 = scmp.lt.s32.totalorder %s875_s6, 4 }
   0x4   : > { %p89_p2 = pnand %p594_p0, %p88_p1 }
   0x6   : > { %92 = sbr.rel (%p89_p2) target bundleno = 393 (0x189), region = 24 }
   0xb   : > { %s595_s8 = sshll.u32 %s590_s7, 5  ;;  %vm184_vm0 = vcmask 523264  }
   0xc   : > { %p109_p3 = scmp.lt.s32.totalorder %s595_s8, 95 }
   0xe   : > { %s2130_s8 = smov (!%p109_p3, %s595_s8), 95 }
   0xf   : > { %s596_s9 = sshll.u32 %s2130_s8, 3  ;;  %s598_s21 = sshll.u32 %s2130_s8, 2 }
  0x10   : > { %s901_s12 = scalar_lea.vmem %s1843_s0, %s596_s9  ;;  %s1658_s24 = scalar_lea.vmem %s1844_s1, %s598_s21 }
  0x11   : > { %v904_v0 = vld [vmem:[%s901_s12] sm:$0xff]  ;;  %v907_v1 = vld [vmem:[%s901_s12 + $0x8] sm:$0xff]  ;;  %v910_v2 = vld [vmem:[%s901_s12 + $0x10] sm:$0xff] }
  0x12   : > { %v913_v3 = vld [vmem:[%s901_s12 + $0x18] sm:$0xff]  ;;  %v916_v4 = vld [vmem:[%s901_s12 + $0x20] sm:$0xff]  ;;  %v919_v5 = vld [vmem:[%s901_s12 + $0x28] sm:$0xff]  ;;  %v152_v7 = vand.u32 2147483647, %v904_v0 }
  0x13   : > { %v922_v6 = vld [vmem:[%s901_s12 + $0x30] sm:$0xff]  ;;  %v926_v8 = vld [vmem:[%s901_s12 + $0x38] sm:$0xff]  ;;  %v153_v9 = vand.u32 2147483647, %v907_v1  ;;  %v154_v10 = vand.u32 2147483647, %v910_v2 }
  0x14   : > { %v155_v11 = vand.u32 2147483647, %v913_v3  ;;  %v932_v12 = vld [vmem:[%s901_s12 + $0x40] sm:$0xff]  ;;  %v935_v13 = vld [vmem:[%s901_s12 + $0x48] sm:$0xff]  ;;  %v938_v14 = vld [vmem:[%s901_s12 + $0x50] sm:$0xff]  ;;  %v185_v24 = vsel %vm184_vm0, %v152_v7, -inf }
  0x15   : > { %v156_v15 = vand.u32 2147483647, %v916_v4  ;;  %v942_v16 = vld [vmem:[%s901_s12 + $0x58] sm:$0xff]  ;;  %v945_v17 = vld [vmem:[%s901_s12 + $0x60] sm:$0xff]  ;;  %v948_v18 = vld [vmem:[%s901_s12 + $0x68] sm:$0xff]  ;;  %v186_v28 = vsel %vm184_vm0, %v153_v9, -inf }
  0x16   : > { %v157_v19 = vand.u32 2147483647, %v919_v5  ;;  %v952_v20 = vld [vmem:[%s901_s12 + $0x70] sm:$0xff]  ;;  %v955_v21 = vld [vmem:[%s901_s12 + $0x78] sm:$0xff]  ;;  %v958_v22 = vld [vmem:[%s901_s12 + $0x80] sm:$0xff]  ;;  %v187_v29 = vsel %vm184_vm0, %v154_v10, -inf }
  0x17   : > { %v158_v23 = vand.u32 2147483647, %v922_v6  ;;  %v963_v25 = vld [vmem:[%s901_s12 + $0x88] sm:$0xff]  ;;  %v966_v26 = vld [vmem:[%s901_s12 + $0x90] sm:$0xff]  ;;  %v969_v27 = vld [vmem:[%s901_s12 + $0x98] sm:$0xff]  ;;  %v188_v30 = vsel %vm184_vm0, %v155_v11, -inf }
  0x18   : > { %v975_v31 = vld [vmem:[%s901_s12 + $0xa0] sm:$0xff]  ;;  %v978_v32 = vld [vmem:[%s901_s12 + $0xa8] sm:$0xff]  ;;  %v981_v33 = vld [vmem:[%s901_s12 + $0xb0] sm:$0xff]  ;;  %v159_v34 = vand.u32 2147483647, %v926_v8  ;;  %v189_v36 = vsel %vm184_vm0, %v156_v15, -inf }
  0x19   : > { %1914 = vst [vmem:[#allocation2_spill] sm:$0xff] %v978_v32  ;;  %v160_v35 = vand.u32 2147483647, %v932_v12  ;;  %v987_v37 = vld [vmem:[%s901_s12 + $0xb8] sm:$0xff]  ;;  %v990_v38 = vld [vmem:[%s901_s12 + $0xc0] sm:$0xff]  ;;  %v993_v39 = vld [vmem:[%s901_s12 + $0xc8] sm:$0xff]  ;;  %v190_v59 = vmax.f32 %v185_v24, %v189_v36 }
  0x1a   : > { %1915 = vst [vmem:[#allocation3_spill] sm:$0xff] %v981_v33  ;;  %v161_v40 = vand.u32 2147483647, %v935_v13  ;;  %v162_v41 = vand.u32 2147483647, %v938_v14  ;;  %v191_v42 = vsel %vm184_vm0, %v157_v19, -inf }
  0x1b   : > { %1916 = vst [vmem:[#allocation4_spill] sm:$0xff] %v987_v37  ;;  %v193_v43 = vsel %vm184_vm0, %v158_v23, -inf  ;;  %v1000_v44 = vld [vmem:[%s901_s12 + $0xd0] sm:$0xff]  ;;  %v1003_v45 = vld [vmem:[%s901_s12 + $0xd8] sm:$0xff]  ;;  %v1006_v46 = vld [vmem:[%s901_s12 + $0xe0] sm:$0xff]  ;;  %v192_v63 = vmax.f32 %v186_v28, %v191_v42  ;;  %v195_v28 = vsel %vm184_vm0, %v159_v34, -inf }
  0x1c   : > { %1917 = vst [vmem:[#allocation5_spill] sm:$0xff] %v990_v38  ;;  %v163_v47 = vand.u32 2147483647, %v942_v16  ;;  %v164_v48 = vand.u32 2147483647, %v945_v17  ;;  %v1012_v50 = vld [vmem:[%s901_s12 + $0xe8] sm:$0xff]  ;;  %v194_v11 = vmax.f32 %v187_v29, %v193_v43  ;;  %v196_v43 = vmax.f32 %v188_v30, %v195_v28 }
  0x1d   : > { %1918 = vst [vmem:[#allocation6_spill] sm:$0xff] %v993_v39  ;;  %v165_v49 = vand.u32 2147483647, %v948_v18  ;;  %v1015_v51 = vld [vmem:[%s901_s12 + $0xf0] sm:$0xff]  ;;  %v1018_v52 = vld [vmem:[%s901_s12 + $0xf8] sm:$0xff]  ;;  %v197_v42 = vsel %vm184_vm0, %v160_v35, -inf }
  0x1e   : > { %1919 = vst [vmem:[#allocation7_spill] sm:$0xff] %v1000_v44  ;;  %v166_v53 = vand.u32 2147483647, %v952_v20  ;;  %v167_v54 = vand.u32 2147483647, %v955_v21  ;;  %v201_v29 = vsel %vm184_vm0, %v162_v41, -inf }
  0x1f   : > { %1920 = vst [vmem:[#allocation8_spill] sm:$0xff] %v1003_v45  ;;  %v168_v55 = vand.u32 2147483647, %v958_v22  ;;  %v169_v56 = vand.u32 2147483647, %v963_v25 }
  0x20   : > { %1921 = vst [vmem:[#allocation9_spill] sm:$0xff] %v1006_v46  ;;  %v170_v57 = vand.u32 2147483647, %v966_v26  ;;  %v171_v58 = vand.u32 2147483647, %v969_v27 }
  0x21   : > { %1922 = vst [vmem:[#allocation10_spill] sm:$0xff] %v1012_v50  ;;  %v172_v60 = vand.u32 2147483647, %v975_v31  ;;  %v173_v61 = vand.u32 2147483647, %v978_v32  ;;  %v213_v41 = vsel %vm184_vm0, %v168_v55, -inf }
  0x22   : > { %1923 = vst [vmem:[#allocation11_spill] sm:$0xff] %v1015_v51  ;;  %v174_v62 = vand.u32 2147483647, %v981_v33  ;;  %v175_v7 = vand.u32 2147483647, %v987_v37  ;;  %v215_v30 = vsel %vm184_vm0, %v169_v56, -inf }
  0x23   : > { %1924 = vst [vmem:[#allocation12_spill] sm:$0xff] %v1018_v52  ;;  %v176_v9 = vand.u32 2147483647, %v990_v38  ;;  %v177_v10 = vand.u32 2147483647, %v993_v39  ;;  %v199_v38 = vsel %vm184_vm0, %v161_v40, -inf }
  0x24   : > { %v178_v15 = vand.u32 2147483647, %v1000_v44  ;;  %v179_v19 = vand.u32 2147483647, %v1003_v45  ;;  %v180_v23 = vand.u32 2147483647, %v1006_v46  ;;  %v198_v44 = vmax.f32 %v190_v59, %v197_v42 }
  0x25   : > { %v181_v24 = vand.u32 2147483647, %v1012_v50  ;;  %v182_v36 = vand.u32 2147483647, %v1015_v51  ;;  %v183_v33 = vand.u32 2147483647, %v1018_v52  ;;  %v200_v39 = vmax.f32 %v192_v63, %v199_v38 }
  0x26   : > { %v202_v45 = vmax.f32 %v194_v11, %v201_v29  ;;  %v203_v46 = vsel %vm184_vm0, %v163_v47, -inf  ;;  %v205_v50 = vsel %vm184_vm0, %v164_v48, -inf  ;;  %v207_v51 = vsel %vm184_vm0, %v165_v49, -inf }
  0x27   : > { %v209_v52 = vsel %vm184_vm0, %v166_v53, -inf  ;;  %v204_v37 = vmax.f32 %v196_v43, %v203_v46  ;;  %v206_v34 = vmax.f32 %v198_v44, %v205_v50  ;;  %v208_v32 = vmax.f32 %v200_v39, %v207_v51 }
  0x28   : > { %v210_v35 = vmax.f32 %v202_v45, %v209_v52  ;;  %v211_v40 = vsel %vm184_vm0, %v167_v54, -inf  ;;  %v217_v38 = vsel %vm184_vm0, %v170_v57, -inf  ;;  %v219_v49 = vsel %vm184_vm0, %v171_v58, -inf }
  0x29   : > { %v212_v59 = vmax.f32 %v204_v37, %v211_v40  ;;  %v214_v47 = vmax.f32 %v206_v34, %v213_v41  ;;  %v216_v63 = vmax.f32 %v208_v32, %v215_v30  ;;  %v221_v53 = vsel %vm184_vm0, %v172_v60, -inf }
  0x2a   : > { %v218_v48 = vmax.f32 %v210_v35, %v217_v38  ;;  %v223_v44 = vsel %vm184_vm0, %v173_v61, -inf  ;;  %v225_v39 = vsel %vm184_vm0, %v174_v62, -inf  ;;  %v227_v52 = vsel %vm184_vm0, %v175_v7, -inf }
  0x2b   : > { %v220_v45 = vmax.f32 %v212_v59, %v219_v49  ;;  %v222_v46 = vmax.f32 %v214_v47, %v221_v53  ;;  %v224_v50 = vmax.f32 %v216_v63, %v223_v44  ;;  %v229_v54 = vsel %vm184_vm0, %v176_v9, -inf }
  0x2c   : > { %v226_v51 = vmax.f32 %v218_v48, %v225_v39  ;;  %v231_v37 = vsel %vm184_vm0, %v177_v10, -inf  ;;  %v233_v32 = vsel %vm184_vm0, %v178_v15, -inf  ;;  %v235_v60 = vsel %vm184_vm0, %v179_v19, -inf }
  0x2d   : > { %v228_v55 = vmax.f32 %v220_v45, %v227_v52  ;;  %v230_v56 = vmax.f32 %v222_v46, %v229_v54  ;;  %v232_v57 = vmax.f32 %v224_v50, %v231_v37  ;;  %v237_v61 = vsel %vm184_vm0, %v180_v23, -inf }
  0x2e   : > { %v234_v58 = vmax.f32 %v226_v51, %v233_v32  ;;  %v239_v62 = vsel %vm184_vm0, %v181_v24, -inf  ;;  %v241_v11 = vsel %vm184_vm0, %v182_v36, -inf  ;;  %v243_v10 = vsel %vm184_vm0, %v183_v33, -inf }
  0x2f   : > { %v236_v28 = vmax.f32 %v228_v55, %v235_v60  ;;  %v238_v7 = vmax.f32 %v230_v56, %v237_v61  ;;  %v240_v42 = vmax.f32 %v232_v57, %v239_v62 }
  0x30   : > { %v242_v9 = vmax.f32 %v234_v58, %v241_v11 }
  0x31   : > { %v244_v29 = vmax.f32 %v236_v28, %v243_v10  ;;  %v245_v15 = vmax.f32 %v238_v7, %v240_v42 }
  0x33   : > { %v246_v43 = vmax.f32 %v242_v9, %v244_v29 }
  0x35   : > { %v247_v34 = vmax.f32 %v245_v15, %v246_v43 }
  0x37   : > { %248 = vmax.xlane.f32.xlu0 %v247_v34  ;;  %v257_v36 = vrot.slane %v247_v34, 4 }
  0x39   : > { %v258_v38 = vmax.f32 %v247_v34, %v257_v36 }
  0x3b   : > { %v259_v59 = vrot.slane %v258_v38, 2 }
  0x3d   : > { %v260_v47 = vmax.f32 %v258_v38, %v259_v59  ;;  %v1943_v59 = vld [vmem:[#allocation4_spill] sm:$0xff] }
  0x3f   : > { %v261_v63 = vrot.slane %v260_v47, 1 }
  0x41   : > { %v262_v33 = vmax.f32 %v260_v47, %v261_v63  ;;  %v1944_v63 = vld [vmem:[#allocation5_spill] sm:$0xff] }
  0xaa   : > { %v249_v35 = vpop.xlane.xlu0 %248 }
  0xab   : > { %v250_v40 = vrot.slane %v249_v35, 4 }
  0xad   : > { %v251_v19 = vmax.f32 %v249_v35, %v250_v40 }
  0xaf   : > { %v252_v41 = vrot.slane %v251_v19, 2 }
  0xb1   : > { %v253_v23 = vmax.f32 %v251_v19, %v252_v41 }
  0xb3   : > { %v254_v30 = vrot.slane %v253_v23, 1 }
  0xb5   : > { %v255_v24 = vmax.f32 %v253_v23, %v254_v30 }
  0xb7   : > { %601 = vpush %v255_v24 }
  0xe8   : > { %s602_s13 = spop %601 }
  0xe9   : > { %s263_s14 = smul.f32 0.0078125, %s602_s13  ;;  %v290_v55 = vstv %s602_s13 }
  0xea   : > { %s265_s15 = smul.f32 0.015625, %s602_s13 }
  0xeb   : > { %v264_v48 = vstv %s263_s14  ;;  %s269_s16 = smul.f32 0.03125, %s602_s13 }
  0xec   : > { %vm266_vm1 = vcmp.gt.f32.partialorder %v262_v33, %v264_v48  ;;  %v267_v49 = vstv %s265_s15  ;;  %s273_s17 = smul.f32 0.0625, %s602_s13 }
  0xed   : > { %v268_v53 = vsel %vm266_vm1, %v267_v49, %v264_v48  ;;  %vm270_vm2 = vcmp.gt.f32.partialorder %v262_v33, %v267_v49  ;;  %v271_v44 = vstv %s269_s16  ;;  %s277_s18 = smul.f32 0.125, %s602_s13  ;;  %v1948_v49 = vld [vmem:[#allocation7_spill] sm:$0xff] }
  0xee   : > { %v272_v39 = vsel %vm270_vm2, %v271_v44, %v268_v53  ;;  %vm274_vm3 = vcmp.gt.f32.partialorder %v262_v33, %v271_v44  ;;  %v275_v45 = vstv %s273_s17  ;;  %s281_s19 = smul.f32 0.25, %s602_s13  ;;  %v1949_v44 = vld [vmem:[#allocation8_spill] sm:$0xff] }
  0xef   : > { %v276_v46 = vsel %vm274_vm3, %v275_v45, %v272_v39  ;;  %vm278_vm4 = vcmp.gt.f32.partialorder %v262_v33, %v275_v45  ;;  %v279_v50 = vstv %s277_s18  ;;  %s285_s20 = smul.f32 0.5, %s602_s13 }
  0xf0   : > { %v280_v51 = vsel %vm278_vm4, %v279_v50, %v276_v46  ;;  %vm282_vm5 = vcmp.gt.f32.partialorder %v262_v33, %v279_v50  ;;  %v283_v52 = vstv %s281_s19  ;;  %v1950_v50 = vld [vmem:[#allocation9_spill] sm:$0xff] }
  0xf1   : > { %v284_v54 = vsel %vm282_vm5, %v283_v52, %v280_v51  ;;  %vm286_vm6 = vcmp.gt.f32.partialorder %v262_v33, %v283_v52  ;;  %v287_v37 = vstv %s285_s20  ;;  %v1951_v52 = vld [vmem:[#allocation10_spill] sm:$0xff] }
  0xf2   : > { %v288_v32 = vsel %vm286_vm6, %v287_v37, %v284_v54  ;;  %vm289_vm7 = vcmp.gt.f32.partialorder %v262_v33, %v287_v37 }
  0xf3   : > { %v291_v56 = vsel %vm289_vm7, %v290_v55, %v288_v32  ;;  %v1952_v55 = vld [vmem:[#allocation11_spill] sm:$0xff] }
  0xf4   : > { %v1063_v57 = vmul.f32 0.14285715, %v291_v56 }
  0xf6   : > { %1925 = vst [vmem:[#allocation13_spill] sm:$0xff] %v1063_v57  ;;  %v293_v58 = vand.u32 2147483647, %v1063_v57 }
  0xf8   : > { %v294_v60 = vmax.f32 %v293_v58, 1e-09 }
  0xfa   : > { %867 = vrcp.f32 %v294_v60  ;;  %v306_v42 = vand.u32 2147483648, %v294_v60  ;;  %vm300_vm9 = vweird.f32 %v294_v60  ;;  %v304_v9 = vand.u32 2147483647, %v294_v60 }
  0xfc   : > { %v307_v29 = vor.u32 1.1754944e-38, %v306_v42  ;;  %vm305_vm11 = vcmp.eq.f32.partialorder %v304_v9, 8.507059e+37  ;;  %v1953_v42 = vld [vmem:[#allocation12_spill] sm:$0xff] }
 0x100   : > { %v868_v61 = vpop.eup %867 }
 0x101   : > { %v296_v62 = vmul.f32 %v868_v61, %v294_v60  ;;  %vm301_vm8 = vweird.f32 %v868_v61 }
 0x102   : > { %vm302_vm10 = vmor %vm300_vm9, %vm301_vm8 }
 0x103   : > { %v297_v11 = vsub.f32 1.0, %v296_v62 }
 0x105   : > { %v298_v28 = vmul.f32 %v868_v61, %v297_v11 }
 0x107   : > { %v299_v7 = vadd.f32 %v868_v61, %v298_v28 }
 0x109   : > { %v303_v10 = vsel %vm302_vm10, %v868_v61, %v299_v7 }
 0x10a   : > { %v308_v15 = vsel %vm305_vm11, %v307_v29, %v303_v10 }
 0x10b   : > { %v1067_v43 = vmul.f32 %v308_v15, %v904_v0  ;;  %v1070_v34 = vmul.f32 %v308_v15, %v907_v1  ;;  %v1073_v35 = vmul.f32 %v308_v15, %v910_v2  ;;  %v1076_v40 = vmul.f32 %v308_v15, %v913_v3 }
 0x10c   : > { %v1079_v19 = vmul.f32 %v308_v15, %v916_v4  ;;  %v1082_v41 = vmul.f32 %v308_v15, %v919_v5  ;;  %v1085_v23 = vmul.f32 %v308_v15, %v922_v6  ;;  %v1088_v0 = vmul.f32 %v308_v15, %v926_v8 }
 0x10d   : > { %v1091_v1 = vmul.f32 %v308_v15, %v932_v12  ;;  %v1094_v2 = vmul.f32 %v308_v15, %v935_v13  ;;  %v1097_v3 = vmul.f32 %v308_v15, %v938_v14  ;;  %v605_v4 = vcvt.f32.s32 %v1067_v43 }
 0x10e   : > { %1926 = vst [vmem:[#allocation14_spill] sm:$0xff] %v1079_v19  ;;  %v1101_v5 = vmul.f32 %v308_v15, %v942_v16  ;;  %v1104_v6 = vmul.f32 %v308_v15, %v945_v17  ;;  %v1107_v8 = vmul.f32 %v308_v15, %v948_v18  ;;  %v1110_v12 = vmul.f32 %v308_v15, %v952_v20 }
 0x10f   : > { %1927 = vst [vmem:[#allocation15_spill] sm:$0xff] %v1082_v41  ;;  %v1113_v13 = vmul.f32 %v308_v15, %v955_v21  ;;  %v1116_v14 = vmul.f32 %v308_v15, %v958_v22  ;;  %v613_v30 = vcvt.f32.s32 %v1070_v34  ;;  %v621_v16 = vcvt.f32.s32 %v1073_v35  ;;  %v1940_v21 = vld [vmem:[#allocation2_spill] sm:$0xff]  ;;  %v1942_v22 = vld [vmem:[#allocation3_spill] sm:$0xff] }
 0x110   : > { %1928 = vst [vmem:[#allocation16_spill] sm:$0xff] %v1088_v0  ;;  %v1121_v24 = vmul.f32 %v308_v15, %v963_v25  ;;  %v1124_v17 = vmul.f32 %v308_v15, %v966_v26  ;;  %v1127_v18 = vmul.f32 %v308_v15, %v969_v27  ;;  %v1130_v20 = vmul.f32 %v308_v15, %v975_v31  ;;  %v1946_v26 = vld [vmem:[#allocation6_spill] sm:$0xff] }
 0x111   : > { %1929 = vst [vmem:[#allocation17_spill] sm:$0xff] %v1091_v1  ;;  %v1133_v36 = vmul.f32 %v308_v15, %v1940_v21  ;;  %v1136_v38 = vmul.f32 %v308_v15, %v1942_v22  ;;  %v1139_v47 = vmul.f32 %v308_v15, %v1943_v59  ;;  %v606_v25 = vcvt.s32.f32 %v605_v4 }
 0x112   : > { %1930 = vst [vmem:[#allocation18_spill] sm:$0xff] %v1094_v2  ;;  %v1142_v33 = vmul.f32 %v308_v15, %v1944_v63  ;;  %v1145_v48 = vmul.f32 %v308_v15, %v1946_v26  ;;  %v629_v27 = vcvt.f32.s32 %v1076_v40  ;;  %v637_v31 = vcvt.f32.s32 %v1079_v19 }
 0x113   : > { %1931 = vst [vmem:[#allocation19_spill] sm:$0xff] %v1097_v3  ;;  %v1150_v53 = vmul.f32 %v308_v15, %v1948_v49  ;;  %v1153_v39 = vmul.f32 %v308_v15, %v1949_v44  ;;  %v614_v45 = vcvt.s32.f32 %v613_v30  ;;  %v622_v46 = vcvt.s32.f32 %v621_v16 }
 0x114   : > { %1932 = vst [vmem:[#allocation20_spill] sm:$0xff] %v1101_v5  ;;  %v1156_v51 = vmul.f32 %v308_v15, %v1950_v50  ;;  %v1159_v54 = vmul.f32 %v308_v15, %v1951_v52  ;;  %v603_v37 = vand.u32 2147483647, %v1067_v43  ;;  %v611_v32 = vand.u32 2147483647, %v1070_v34 }
 0x115   : > { %1933 = vst [vmem:[#allocation21_spill] sm:$0xff] %v1107_v8  ;;  %v1164_v56 = vmul.f32 %v308_v15, %v1952_v55  ;;  %v607_v58 = vand.u32 2147483647, %v606_v25  ;;  %v608_v60 = vand.u32 2147483648, %v1067_v43  ;;  %v645_v61 = vcvt.f32.s32 %v1082_v41 }
 0x116   : > { %1934 = vst [vmem:[#allocation22_spill] sm:$0xff] %v1110_v12  ;;  %v619_v62 = vand.u32 2147483647, %v1073_v35  ;;  %v627_v11 = vand.u32 2147483647, %v1076_v40  ;;  %v630_v28 = vcvt.s32.f32 %v629_v27  ;;  %v638_v7 = vcvt.s32.f32 %v637_v31 }
 0x117   : > { %1935 = vst [vmem:[#allocation23_spill] sm:$0xff] %v1113_v13  ;;  %v1171_v9 = vmul.f32 %v308_v15, %v1953_v42  ;;  %v615_v10 = vand.u32 2147483647, %v614_v45  ;;  %v623_v29 = vand.u32 2147483647, %v622_v46  ;;  %vm1174_vm12 = vcmp.lt.f32.partialorder %v603_v37, 8388608.0 }
 0x118   : > { %1936 = vst [vmem:[#allocation24_spill] sm:$0xff] %v1116_v14  ;;  %v635_v4 = vand.u32 2147483647, %v1079_v19  ;;  %vm1178_vm13 = vcmp.lt.f32.partialorder %v611_v32, 8388608.0  ;;  %v616_v21 = vand.u32 2147483648, %v1070_v34  ;;  %v624_v22 = vand.u32 2147483648, %v1073_v35 }
 0x119   : > { %1937 = vst [vmem:[#allocation25_spill] sm:$0xff] %v1124_v17  ;;  %v1184_v59 = vor.u32 %v608_v60, %v607_v58  ;;  %v646_v15 = vcvt.s32.f32 %v645_v61  ;;  %v653_v25 = vcvt.f32.s32 %v1085_v23  ;;  %v661_v63 = vcvt.f32.s32 %v1088_v0 }
 0x11a   : > { %1938 = vst [vmem:[#allocation26_spill] sm:$0xff] %v1127_v18  ;;  %vm1188_vm14 = vcmp.lt.f32.partialorder %v619_v62, 8388608.0  ;;  %v631_v27 = vand.u32 2147483647, %v630_v28  ;;  %v632_v31 = vand.u32 2147483648, %v1076_v40  ;;  %v1193_v44 = vor.u32 %v616_v21, %v615_v10 }
 0x11b   : > { %1939 = vst [vmem:[#allocation27_spill] sm:$0xff] %v1130_v20  ;;  %v639_v49 = vand.u32 2147483647, %v638_v7  ;;  %v1195_v45 = vor.u32 %v624_v22, %v623_v29  ;;  %vm1197_vm15 = vcmp.lt.f32.partialorder %v627_v11, 8388608.0  ;;  %vm1201_vm0 = vcmp.lt.f32.partialorder %v635_v4, 8388608.0  ;;  %v2065_v22 = vld [vmem:[#allocation13_spill] sm:$0xff] }
 0x11c   : > { %1941 = vst [vmem:[#allocation2_spill] sm:$0xff] %v1133_v36  ;;  %v1962_v50 = vmov 0  ;;  %v640_v52 = vand.u32 2147483648, %v1079_v19  ;;  %v643_v37 = vand.u32 2147483647, %v1082_v41  ;;  %v669_v32 = vcvt.f32.s32 %v1091_v1 }
 0x11d   : > { %1945 = vst [vmem:[#allocation3_spill] sm:$0xff] %v1142_v33  ;;  %v1963_v50 = vsel %vm1201_vm0, 4294967295, %v1962_v50  ;;  %v677_v55 = vcvt.f32.s32 %v1094_v2  ;;  %v647_v60 = vand.u32 2147483647, %v646_v15  ;;  %v654_v61 = vcvt.s32.f32 %v653_v25 }
 0x11e   : > { %1947 = vst [vmem:[#allocation4_spill] sm:$0xff] %v1145_v48  ;;  %v662_v62 = vcvt.s32.f32 %v661_v63  ;;  %v1213_v11 = vor.u32 %v632_v31, %v631_v27  ;;  %v1215_v28 = vor.u32 %v640_v52, %v639_v49  ;;  %v651_v7 = vand.u32 2147483647, %v1085_v23 }
 0x11f   : > { %1964 = vst [vmem:[#allocation5_spill] sm:$0xff] %v1963_v50  ;;  %v659_v42 = vand.u32 2147483647, %v1088_v0  ;;  %v648_v4 = vand.u32 2147483648, %v1082_v41  ;;  %v685_v21 = vcvt.f32.s32 %v1097_v3  ;;  %vm1229_vm1 = vcmp.lt.f32.partialorder %v643_v37, 8388608.0 }
 0x120   : > { %1965 = vst [vmem:[#allocation6_spill] sm:$0xff] %v1215_v28  ;;  %v656_v15 = vand.u32 2147483648, %v1085_v23  ;;  %v670_v25 = vcvt.s32.f32 %v669_v32  ;;  %v678_v63 = vcvt.s32.f32 %v677_v55  ;;  %v655_v31 = vand.u32 2147483647, %v654_v61 }
 0x121   : > { %v1234_v27 = vor.u32 %v648_v4, %v647_v60  ;;  %v663_v49 = vand.u32 2147483647, %v662_v62  ;;  %v667_v52 = vand.u32 2147483647, %v1091_v1  ;;  %vm1245_vm2 = vcmp.lt.f32.partialorder %v651_v7, 8388608.0 }
 0x122   : > { %vm1249_vm3 = vcmp.lt.f32.partialorder %v659_v42, 8388608.0  ;;  %v1971_v32 = vmov 0  ;;  %v664_v55 = vand.u32 2147483648, %v1088_v0  ;;  %v675_v60 = vand.u32 2147483647, %v1094_v2 }
 0x123   : > { %1968 = vst [vmem:[#allocation7_spill] sm:$0xff] %v1234_v27  ;;  %v1972_v32 = vsel %vm1249_vm3, 4294967295, %v1971_v32  ;;  %v686_v61 = vcvt.s32.f32 %v685_v21  ;;  %v693_v62 = vcvt.f32.s32 %v1101_v5  ;;  %v671_v4 = vand.u32 2147483647, %v670_v25 }
 0x124   : > { %1973 = vst [vmem:[#allocation8_spill] sm:$0xff] %v1972_v32  ;;  %v672_v29 = vand.u32 2147483648, %v1091_v1  ;;  %v679_v58 = vand.u32 2147483647, %v678_v63  ;;  %v701_v7 = vcvt.f32.s32 %v1104_v6  ;;  %v1262_v37 = vor.u32 %v656_v15, %v655_v31 }
 0x125   : > { %v1264_v57 = vor.u32 %v664_v55, %v663_v49  ;;  %vm1266_vm4 = vcmp.lt.f32.partialorder %v667_v52, 8388608.0  ;;  %v1974_v19 = vmov 0  ;;  %v680_v21 = vand.u32 2147483648, %v1094_v2 }
 0x126   : > { %v1975_v19 = vsel %vm1266_vm4, 4294967295, %v1974_v19  ;;  %v683_v25 = vand.u32 2147483647, %v1097_v3  ;;  %v709_v63 = vcvt.f32.s32 %v1107_v8  ;;  %v717_v28 = vcvt.f32.s32 %v1110_v12 }
 0x127   : > { %1976 = vst [vmem:[#allocation9_spill] sm:$0xff] %v1975_v19  ;;  %vm1274_vm5 = vcmp.lt.f32.partialorder %v675_v60, 8388608.0  ;;  %v1977_v50 = vmov 0  ;;  %v687_v15 = vand.u32 2147483647, %v686_v61  ;;  %v694_v49 = vcvt.s32.f32 %v693_v62 }
 0x128   : > { %v1978_v50 = vsel %vm1274_vm5, 4294967295, %v1977_v50  ;;  %v691_v31 = vand.u32 2147483647, %v1101_v5  ;;  %v1279_v52 = vor.u32 %v672_v29, %v671_v4  ;;  %v1281_v55 = vor.u32 %v680_v21, %v679_v58 }
 0x129   : > { %1979 = vst [vmem:[#allocation10_spill] sm:$0xff] %v1978_v50  ;;  %v699_v42 = vand.u32 2147483647, %v1104_v6  ;;  %v702_v41 = vcvt.s32.f32 %v701_v7  ;;  %v688_v61 = vand.u32 2147483648, %v1097_v3  ;;  %v725_v29 = vcvt.f32.s32 %v1113_v13 }
 0x12a   : > { %1980 = vst [vmem:[#allocation11_spill] sm:$0xff] %v1281_v55  ;;  %vm1294_vm6 = vcmp.lt.f32.partialorder %v683_v25, 8388608.0  ;;  %v1981_v58 = vmov 0  ;;  %v707_v62 = vand.u32 2147483647, %v1107_v8  ;;  %v710_v4 = vcvt.s32.f32 %v709_v63 }
 0x12b   : > { %v1982_v58 = vsel %vm1294_vm6, 4294967295, %v1981_v58  ;;  %v718_v7 = vcvt.s32.f32 %v717_v28  ;;  %v1299_v21 = vor.u32 %v688_v61, %v687_v15  ;;  %vm1301_vm7 = vcmp.lt.f32.partialorder %v691_v31, 8388608.0 }
 0x12c   : > { %1983 = vst [vmem:[#allocation12_spill] sm:$0xff] %v1982_v58  ;;  %v1985_v27 = vmov 0  ;;  %v695_v32 = vand.u32 2147483647, %v694_v49  ;;  %v696_v60 = vand.u32 2147483648, %v1101_v5  ;;  %vm1314_vm8 = vcmp.lt.f32.partialorder %v699_v42, 8388608.0 }
 0x12d   : > { %1984 = vst [vmem:[#allocation28_spill] sm:$0xff] %v1299_v21  ;;  %v1986_v27 = vsel %vm1301_vm7, 4294967295, %v1985_v27  ;;  %v1987_v28 = vmov 0  ;;  %v703_v15 = vand.u32 2147483647, %v702_v41  ;;  %v704_v31 = vand.u32 2147483648, %v1104_v6 }
 0x12e   : > { %v1988_v28 = vsel %vm1314_vm8, 4294967295, %v1987_v28  ;;  %v715_v49 = vand.u32 2147483647, %v1110_v12  ;;  %v726_v61 = vcvt.s32.f32 %v725_v29  ;;  %v733_v0 = vcvt.f32.s32 %v1116_v14 }
 0x12f   : > { %vm1321_vm9 = vcmp.lt.f32.partialorder %v707_v62, 8388608.0  ;;  %v1989_v19 = vmov 0  ;;  %v711_v25 = vand.u32 2147483647, %v710_v4  ;;  %v719_v1 = vand.u32 2147483647, %v718_v7 }
 0x130   : > { %v1990_v19 = vsel %vm1321_vm9, 4294967295, %v1989_v19  ;;  %v741_v63 = vcvt.f32.s32 %v1121_v24  ;;  %v1330_v42 = vor.u32 %v696_v60, %v695_v32  ;;  %v712_v2 = vand.u32 2147483648, %v1107_v8 }
 0x131   : > { %1991 = vst [vmem:[#allocation29_spill] sm:$0xff] %v1990_v19  ;;  %v723_v29 = vand.u32 2147483647, %v1113_v13  ;;  %v1334_v55 = vor.u32 %v704_v31, %v703_v15  ;;  %v720_v62 = vand.u32 2147483648, %v1110_v12  ;;  %v749_v4 = vcvt.f32.s32 %v1124_v17 }
 0x132   : > { %1992 = vst [vmem:[#allocation30_spill] sm:$0xff] %v1330_v42  ;;  %v757_v7 = vcvt.f32.s32 %v1127_v18  ;;  %vm1339_vm10 = vcmp.lt.f32.partialorder %v715_v49, 8388608.0  ;;  %v1993_v50 = vmov 0  ;;  %v727_v58 = vand.u32 2147483647, %v726_v61 }
 0x133   : > { %v1994_v50 = vsel %vm1339_vm10, 4294967295, %v1993_v50  ;;  %v731_v32 = vand.u32 2147483647, %v1116_v14  ;;  %v734_v60 = vcvt.s32.f32 %v733_v0  ;;  %v1344_v41 = vor.u32 %v712_v2, %v711_v25 }
 0x134   : > { %1995 = vst [vmem:[#allocation31_spill] sm:$0xff] %v1994_v50  ;;  %v1346_v3 = vor.u32 %v720_v62, %v719_v1  ;;  %v739_v15 = vand.u32 2147483647, %v1121_v24  ;;  %v742_v31 = vcvt.s32.f32 %v741_v63  ;;  %vm1353_vm11 = vcmp.lt.f32.partialorder %v723_v29, 8388608.0 }
 0x135   : > { %v1997_v49 = vmov 0  ;;  %v728_v61 = vand.u32 2147483648, %v1113_v13  ;;  %v765_v0 = vcvt.f32.s32 %v1130_v20  ;;  %v747_v2 = vand.u32 2147483647, %v1124_v17 }
 0x136   : > { %1996 = vst [vmem:[#allocation32_spill] sm:$0xff] %v1346_v3  ;;  %v1998_v49 = vsel %vm1353_vm11, 4294967295, %v1997_v49  ;;  %v750_v25 = vcvt.s32.f32 %v749_v4  ;;  %v758_v63 = vcvt.s32.f32 %v757_v7  ;;  %vm1366_vm7 = vcmp.lt.f32.partialorder %v731_v32, 8388608.0 }
 0x137   : > { %1999 = vst [vmem:[#allocation33_spill] sm:$0xff] %v1998_v49  ;;  %v1364_v62 = vor.u32 %v728_v61, %v727_v58  ;;  %v2001_v29 = vmov 0  ;;  %v735_v21 = vand.u32 2147483647, %v734_v60  ;;  %v736_v5 = vand.u32 2147483648, %v1116_v14 }
 0x138   : > { %v2002_v29 = vsel %vm1366_vm7, 4294967295, %v2001_v29  ;;  %vm1379_vm8 = vcmp.lt.f32.partialorder %v739_v15, 8388608.0  ;;  %v2003_v58 = vmov 0  ;;  %v743_v7 = vand.u32 2147483647, %v742_v31 }
 0x139   : > { %2000 = vst [vmem:[#allocation34_spill] sm:$0xff] %v1364_v62  ;;  %v2004_v58 = vsel %vm1379_vm8, 4294967295, %v2003_v58  ;;  %v744_v32 = vand.u32 2147483648, %v1121_v24  ;;  %v755_v60 = vand.u32 2147483647, %v1127_v18  ;;  %v766_v61 = vcvt.s32.f32 %v765_v0 }
 0x13a   : > { %v773_v1 = vcvt.f32.s32 %v1133_v36  ;;  %vm1386_vm6 = vcmp.lt.f32.partialorder %v747_v2, 8388608.0  ;;  %v2005_v19 = vmov 0  ;;  %v751_v42 = vand.u32 2147483647, %v750_v25 }
 0x13b   : > { %v2006_v19 = vsel %vm1386_vm6, 4294967295, %v2005_v19  ;;  %v759_v8 = vand.u32 2147483647, %v758_v63  ;;  %v781_v4 = vcvt.f32.s32 %v1136_v38  ;;  %v1395_v31 = vor.u32 %v736_v5, %v735_v21 }
 0x13c   : > { %2007 = vst [vmem:[#allocation35_spill] sm:$0xff] %v2006_v19  ;;  %v752_v12 = vand.u32 2147483648, %v1124_v17  ;;  %v763_v0 = vand.u32 2147483647, %v1130_v20  ;;  %v1399_v3 = vor.u32 %v744_v32, %v743_v7  ;;  %v760_v2 = vand.u32 2147483648, %v1127_v18 }
 0x13d   : > { %2008 = vst [vmem:[#allocation36_spill] sm:$0xff] %v1395_v31  ;;  %v789_v25 = vcvt.f32.s32 %v1139_v47  ;;  %v797_v63 = vcvt.f32.s32 %v1142_v33  ;;  %vm1404_vm10 = vcmp.lt.f32.partialorder %v755_v60, 8388608.0  ;;  %v2009_v50 = vmov 0 }
 0x13e   : > { %v2010_v50 = vsel %vm1404_vm10, 4294967295, %v2009_v50  ;;  %v767_v49 = vand.u32 2147483647, %v766_v61  ;;  %v771_v5 = vand.u32 2147483647, %v1133_v36  ;;  %v774_v21 = vcvt.s32.f32 %v773_v1 }
 0x13f   : > { %2011 = vst [vmem:[#allocation37_spill] sm:$0xff] %v2010_v50  ;;  %v1409_v15 = vor.u32 %v752_v12, %v751_v42  ;;  %v1411_v13 = vor.u32 %v760_v2, %v759_v8  ;;  %v779_v7 = vand.u32 2147483647, %v1136_v38  ;;  %v782_v32 = vcvt.s32.f32 %v781_v4 }
 0x140   : > { %vm1418_vm11 = vcmp.lt.f32.partialorder %v763_v0, 8388608.0  ;;  %v2013_v60 = vmov 0  ;;  %v768_v61 = vand.u32 2147483648, %v1130_v20  ;;  %v805_v1 = vcvt.f32.s32 %v1145_v48 }
 0x141   : > { %2012 = vst [vmem:[#allocation38_spill] sm:$0xff] %v1411_v13  ;;  %v2014_v60 = vsel %vm1418_vm11, 4294967295, %v2013_v60  ;;  %v787_v12 = vand.u32 2147483647, %v1139_v47  ;;  %v790_v42 = vcvt.s32.f32 %v789_v25  ;;  %v798_v4 = vcvt.s32.f32 %v797_v63 }
 0x142   : > { %2015 = vst [vmem:[#allocation39_spill] sm:$0xff] %v2014_v60  ;;  %v1429_v2 = vor.u32 %v768_v61, %v767_v49  ;;  %vm1431_vm7 = vcmp.lt.f32.partialorder %v771_v5, 8388608.0  ;;  %v2017_v0 = vmov 0  ;;  %v775_v62 = vand.u32 2147483647, %v774_v21 }
 0x143   : > { %v2018_v0 = vsel %vm1431_vm7, 4294967295, %v2017_v0  ;;  %v776_v14 = vand.u32 2147483648, %v1133_v36  ;;  %vm1444_vm8 = vcmp.lt.f32.partialorder %v779_v7, 8388608.0  ;;  %v2019_v49 = vmov 0 }
 0x144   : > { %2016 = vst [vmem:[#allocation40_spill] sm:$0xff] %v1429_v2  ;;  %v2020_v49 = vsel %vm1444_vm8, 4294967295, %v2019_v49  ;;  %v783_v63 = vand.u32 2147483647, %v782_v32  ;;  %v784_v5 = vand.u32 2147483648, %v1136_v38  ;;  %v806_v61 = vcvt.s32.f32 %v805_v1 }
 0x145   : > { %v795_v21 = vand.u32 2147483647, %v1142_v33  ;;  %v813_v8 = vcvt.f32.s32 %v1150_v53  ;;  %vm1451_vm9 = vcmp.lt.f32.partialorder %v787_v12, 8388608.0  ;;  %v2021_v19 = vmov 0 }
 0x146   : > { %v2022_v19 = vsel %vm1451_vm9, 4294967295, %v2021_v19  ;;  %v791_v31 = vand.u32 2147483647, %v790_v42  ;;  %v799_v17 = vand.u32 2147483647, %v798_v4  ;;  %v821_v25 = vcvt.f32.s32 %v1153_v39 }
 0x147   : > { %2023 = vst [vmem:[#allocation41_spill] sm:$0xff] %v2022_v19  ;;  %v1460_v32 = vor.u32 %v776_v14, %v775_v62  ;;  %v792_v18 = vand.u32 2147483648, %v1139_v47  ;;  %v803_v1 = vand.u32 2147483647, %v1145_v48  ;;  %v1464_v13 = vor.u32 %v784_v5, %v783_v63 }
 0x148   : > { %v800_v12 = vand.u32 2147483648, %v1142_v33  ;;  %v829_v42 = vcvt.f32.s32 %v1156_v51  ;;  %v837_v4 = vcvt.f32.s32 %v1159_v54  ;;  %vm1469_vm10 = vcmp.lt.f32.partialorder %v795_v21, 8388608.0 }
 0x149   : > { %2024 = vst [vmem:[#allocation42_spill] sm:$0xff] %v1460_v32  ;;  %v2025_v50 = vmov 0  ;;  %v807_v60 = vand.u32 2147483647, %v806_v61  ;;  %v811_v14 = vand.u32 2147483647, %v1150_v53  ;;  %v814_v62 = vcvt.s32.f32 %v813_v8 }
 0x14a   : > { %v2026_v50 = vsel %vm1469_vm10, 4294967295, %v2025_v50  ;;  %v1474_v7 = vor.u32 %v792_v18, %v791_v31  ;;  %v1476_v20 = vor.u32 %v800_v12, %v799_v17  ;;  %v822_v63 = vcvt.s32.f32 %v821_v25 }
 0x14b   : > { %2027 = vst [vmem:[#allocation43_spill] sm:$0xff] %v2026_v50  ;;  %v845_v5 = vcvt.f32.s32 %v1164_v56  ;;  %vm1483_vm11 = vcmp.lt.f32.partialorder %v803_v1, 8388608.0  ;;  %v2029_v21 = vmov 0  ;;  %v808_v61 = vand.u32 2147483648, %v1145_v48 }
 0x14c   : > { %2028 = vst [vmem:[#allocation44_spill] sm:$0xff] %v1476_v20  ;;  %v2030_v21 = vsel %vm1483_vm11, 4294967295, %v2029_v21  ;;  %v819_v8 = vand.u32 2147483647, %v1153_v39  ;;  %v827_v18 = vand.u32 2147483647, %v1156_v51  ;;  %v830_v31 = vcvt.s32.f32 %v829_v42 }
 0x14d   : > { %v838_v25 = vcvt.s32.f32 %v837_v4  ;;  %v1494_v12 = vor.u32 %v808_v61, %v807_v60  ;;  %vm1496_vm7 = vcmp.lt.f32.partialorder %v811_v14, 8388608.0  ;;  %v815_v2 = vand.u32 2147483647, %v814_v62 }
 0x14e   : > { %v816_v36 = vand.u32 2147483648, %v1150_v53  ;;  %v823_v4 = vand.u32 2147483647, %v822_v63  ;;  %v846_v60 = vcvt.s32.f32 %v845_v5  ;;  %vm1509_vm8 = vcmp.lt.f32.partialorder %v819_v8, 8388608.0 }
 0x14f   : > { %v824_v62 = vand.u32 2147483648, %v1153_v39  ;;  %v835_v61 = vand.u32 2147483647, %v1159_v54  ;;  %v853_v17 = vcvt.f32.s32 %v1171_v9  ;;  %vm1516_vm6 = vcmp.lt.f32.partialorder %v827_v18, 8388608.0 }
 0x150   : > { %v831_v32 = vand.u32 2147483647, %v830_v31  ;;  %v832_v50 = vand.u32 2147483648, %v1156_v51  ;;  %v839_v42 = vand.u32 2147483647, %v838_v25  ;;  %v1525_v5 = vor.u32 %v816_v36, %v815_v2 }
 0x151   : > { %v843_v8 = vand.u32 2147483647, %v1164_v56  ;;  %v2037_v18 = vsel %vm1174_vm12, %v1184_v59, %v1067_v43  ;;  %v1533_v20 = vor.u32 %v824_v62, %v823_v4  ;;  %v840_v31 = vand.u32 2147483648, %v1159_v54  ;;  %v2049_v62 = vld [vmem:[#allocation7_spill] sm:$0xff] }
 0x152   : > { %v373_v33 = vmax.f32 %v2037_v18, -8.0  ;;  %v847_v25 = vand.u32 2147483647, %v846_v60  ;;  %v2038_v63 = vsel %vm1178_vm13, %v1193_v44, %v1070_v34  ;;  %vm1541_vm11 = vcmp.lt.f32.partialorder %v835_v61, 8388608.0  ;;  %v2050_v61 = vld [vmem:[#allocation15_spill] sm:$0xff] }
 0x153   : > { %v374_v36 = vmax.f32 %v2038_v63, -8.0  ;;  %v848_v30 = vand.u32 2147483648, %v1164_v56  ;;  %v854_v48 = vcvt.s32.f32 %v853_v17  ;;  %v2041_v43 = vsel %vm1188_vm14, %v1195_v45, %v1073_v35 }
 0x154   : > { %v375_v59 = vmax.f32 %v2041_v43, -8.0  ;;  %v1551_v4 = vor.u32 %v832_v50, %v831_v32  ;;  %v1553_v16 = vor.u32 %v840_v31, %v839_v42  ;;  %v851_v34 = vand.u32 2147483647, %v1171_v9  ;;  %v2046_v50 = vld [vmem:[#allocation6_spill] sm:$0xff] }
 0x155   : > { %v2042_v44 = vsel %vm1197_vm15, %v1213_v11, %v1076_v40  ;;  %v818_v26 = vsel %vm1496_vm7, %v1525_v5, %v1150_v53  ;;  %vm1565_vm12 = vcmp.lt.f32.partialorder %v843_v8, 8388608.0  ;;  %v2047_v32 = vld [vmem:[#allocation14_spill] sm:$0xff]  ;;  %v405_v46 = vmin.f32 %v373_v33, 7.0 }
 0x156   : > { %v376_v60 = vmax.f32 %v2042_v44, -8.0  ;;  %v2048_v17 = vsel %vm1201_vm0, %v2046_v50, %v2047_v32  ;;  %v826_v40 = vsel %vm1509_vm8, %v1533_v20, %v1153_v39  ;;  %v1578_v11 = vor.u32 %v848_v30, %v847_v25  ;;  %v2059_v50 = vld [vmem:[#allocation17_spill] sm:$0xff] }
 0x157   : > { %v377_v42 = vmax.f32 %v2048_v17, -8.0  ;;  %v2051_v63 = vsel %vm1229_vm1, %v2049_v62, %v2050_v61  ;;  %v406_v18 = vmin.f32 %v374_v36, 7.0  ;;  %v855_v31 = vand.u32 2147483647, %v854_v48  ;;  %v2062_v61 = vld [vmem:[#allocation11_spill] sm:$0xff] }
 0x158   : > { %v378_v8 = vmax.f32 %v2051_v63, -8.0  ;;  %v856_v43 = vand.u32 2147483648, %v1171_v9  ;;  %v2052_v33 = vsel %vm1245_vm2, %v1262_v37, %v1085_v23  ;;  %v407_v45 = vmin.f32 %v375_v59, 7.0  ;;  %v2056_v23 = vld [vmem:[#allocation16_spill] sm:$0xff] }
 0x159   : > { %v379_v44 = vmax.f32 %v2052_v33, -8.0  ;;  %vm1599_vm13 = vcmp.lt.f32.partialorder %v851_v34, 8388608.0  ;;  %v2057_v37 = vsel %vm1249_vm3, %v1264_v57, %v2056_v23  ;;  %v408_v30 = vmin.f32 %v376_v60, 7.0  ;;  %v2063_v34 = vld [vmem:[#allocation18_spill] sm:$0xff]  ;;  %v2066_v60 = vld [vmem:[#allocation12_spill] sm:$0xff] }
 0x15a   : > { %v380_v36 = vmax.f32 %v2057_v37, -8.0  ;;  %v2060_v32 = vsel %vm1266_vm4, %v1279_v52, %v2059_v50  ;;  %v2064_v63 = vsel %vm1274_vm5, %v2062_v61, %v2063_v34  ;;  %v409_v48 = vmin.f32 %v377_v42, 7.0  ;;  %v2068_v23 = vld [vmem:[#allocation28_spill] sm:$0xff]  ;;  %v2069_v37 = vld [vmem:[#allocation19_spill] sm:$0xff]  ;;  %v2072_v42 = vld [vmem:[#allocation30_spill] sm:$0xff] }
 0x15b   : > { %v381_v17 = vmax.f32 %v2060_v32, -8.0  ;;  %v382_v33 = vmax.f32 %v2064_v63, -8.0  ;;  %v437_v10 = vmul.f32 %v405_v46, %v2065_v22  ;;  %vm2067_vm14 = vnez %v2066_v60  ;;  %v2073_v46 = vld [vmem:[#allocation20_spill] sm:$0xff] }
 0x15c   : > { %v2070_v52 = vsel %vm2067_vm14, %v2068_v23, %v2069_v37  ;;  %v410_v50 = vmin.f32 %v378_v8, 7.0  ;;  %v438_v32 = vmul.f32 %v406_v18, %v2065_v22  ;;  %v1630_v62 = vor.u32 %v856_v43, %v855_v31  ;;  %v2077_v23 = vld [vmem:[#allocation29_spill] sm:$0xff] }
 0x15d   : > { %v383_v59 = vmax.f32 %v2070_v52, -8.0  ;;  %vm2071_vm15 = vnez %v1986_v27  ;;  %v411_v63 = vmin.f32 %v379_v44, 7.0  ;;  %v439_v57 = vmul.f32 %v407_v45, %v2065_v22  ;;  %v2079_v18 = vld [vmem:[#allocation21_spill] sm:$0xff]  ;;  %v2081_v52 = vld [vmem:[#allocation31_spill] sm:$0xff]  ;;  %v2083_v44 = vld [vmem:[#allocation32_spill] sm:$0xff] }
 0x15e   : > { %v2074_v61 = vsel %vm2071_vm15, %v2072_v42, %v2073_v46  ;;  %vm2075_vm0 = vnez %v1988_v28  ;;  %vm2078_vm1 = vnez %v2077_v23  ;;  %v412_v27 = vmin.f32 %v380_v36, 7.0  ;;  %v2084_v42 = vld [vmem:[#allocation22_spill] sm:$0xff]  ;;  %v2089_v36 = vld [vmem:[#allocation23_spill] sm:$0xff] }
 0x15f   : > { %v384_v34 = vmax.f32 %v2074_v61, -8.0  ;;  %v2076_v60 = vsel %vm2075_vm0, %v1334_v55, %v1104_v6  ;;  %v2080_v31 = vsel %vm2078_vm1, %v1344_v41, %v2079_v18  ;;  %v440_v37 = vmul.f32 %v408_v30, %v2065_v22  ;;  %v2086_v55 = vld [vmem:[#allocation33_spill] sm:$0xff]  ;;  %v2088_v41 = vld [vmem:[#allocation34_spill] sm:$0xff] }
 0x160   : > { %v385_v8 = vmax.f32 %v2076_v60, -8.0  ;;  %v386_v43 = vmax.f32 %v2080_v31, -8.0  ;;  %vm2082_vm2 = vnez %v2081_v52  ;;  %v413_v28 = vmin.f32 %v381_v17, 7.0  ;;  %v2093_v17 = vld [vmem:[#allocation24_spill] sm:$0xff] }
 0x161   : > { %v2085_v45 = vsel %vm2082_vm2, %v2083_v44, %v2084_v42  ;;  %v441_v61 = vmul.f32 %v409_v48, %v2065_v22  ;;  %v469_v6 = vpack.c.bf16 %v437_v10, %v437_v10  ;;  %vm2087_vm3 = vnez %v2086_v55  ;;  %v2092_v48 = vld [vmem:[#allocation36_spill] sm:$0xff] }
 0x162   : > { %v387_v46 = vmax.f32 %v2085_v45, -8.0  ;;  %v2090_v30 = vsel %vm2087_vm3, %v2088_v41, %v2089_v36  ;;  %v414_v23 = vmin.f32 %v382_v33, 7.0  ;;  %v442_v18 = vmul.f32 %v410_v50, %v2065_v22 }
 0x163   : > { %v388_v60 = vmax.f32 %v2090_v30, -8.0  ;;  %v470_v31 = vpack.c.bf16 %v438_v32, %v438_v32  ;;  %vm2091_vm4 = vnez %v2002_v29  ;;  %v415_v44 = vmin.f32 %v383_v59, 7.0 }
 0x164   : > { %v2094_v10 = vsel %vm2091_vm4, %v2092_v48, %v2093_v17  ;;  %v443_v42 = vmul.f32 %v411_v63, %v2065_v22  ;;  %v471_v45 = vpack.c.bf16 %v439_v57, %v439_v57  ;;  %v416_v55 = vmin.f32 %v384_v34, 7.0 }
 0x165   : > { %v389_v52 = vmax.f32 %v2094_v10, -8.0  ;;  %v444_v41 = vmul.f32 %v412_v27, %v2065_v22  ;;  %v472_v36 = vpack.c.bf16 %v440_v37, %v440_v37  ;;  %vm501_vm5 = vcmask 519168   ;;  %v2099_v37 = vld [vmem:[#allocation25_spill] sm:$0xff]  ;;  %v2109_v10 = vld [vmem:[#allocation27_spill] sm:$0xff] }
 0x166   : > { %v858_v29 = vsel %vm1599_vm13, %v1630_v62, %v1171_v9  ;;  %v417_v33 = vmin.f32 %v385_v8, 7.0  ;;  %v445_v50 = vmul.f32 %v413_v28, %v2065_v22  ;;  %v473_v32 = vpack.c.bf16 %v441_v61, %v441_v61  ;;  %502 = vst.msk [vmem:[%s1658_s24] sm:$0xf] %vm501_vm5, %v469_v6  ;;  %v2097_v8 = vld [vmem:[#allocation35_spill] sm:$0xff] }
 0x167   : > { %vm2095_vm14 = vnez %v2004_v58  ;;  %v418_v34 = vmin.f32 %v386_v43, 7.0  ;;  %v446_v63 = vmul.f32 %v414_v23, %v2065_v22  ;;  %v474_v27 = vpack.c.bf16 %v442_v18, %v442_v18  ;;  %503 = vst.msk [vmem:[%s1658_s24 + $0x4] sm:$0xf] %vm501_vm5, %v470_v31  ;;  %v2104_v43 = vld [vmem:[#allocation26_spill] sm:$0xff] }
 0x168   : > { %v2096_v57 = vsel %vm2095_vm14, %v1399_v3, %v1121_v24  ;;  %vm2098_vm15 = vnez %v2097_v8  ;;  %v419_v6 = vmin.f32 %v387_v46, 7.0  ;;  %v447_v58 = vmul.f32 %v415_v44, %v2065_v22  ;;  %504 = vst.msk [vmem:[%s1658_s24 + $0x8] sm:$0xf] %vm501_vm5, %v471_v45  ;;  %v2101_v3 = vld [vmem:[#allocation37_spill] sm:$0xff]  ;;  %v2103_v24 = vld [vmem:[#allocation38_spill] sm:$0xff]  ;;  %v2108_v46 = vld [vmem:[#allocation40_spill] sm:$0xff] }
 0x169   : > { %v390_v59 = vmax.f32 %v2096_v57, -8.0  ;;  %v2100_v28 = vsel %vm2098_vm15, %v1409_v15, %v2099_v37  ;;  %v475_v30 = vpack.c.bf16 %v443_v42, %v443_v42  ;;  %vm2102_vm0 = vnez %v2101_v3  ;;  %505 = vst.msk [vmem:[%s1658_s24 + $0xc] sm:$0xf] %vm501_vm5, %v472_v36  ;;  %v2106_v15 = vld [vmem:[#allocation39_spill] sm:$0xff] }
 0x16a   : > { %v391_v61 = vmax.f32 %v2100_v28, -8.0  ;;  %v2105_v23 = vsel %vm2102_vm0, %v2103_v24, %v2104_v43  ;;  %v420_v31 = vmin.f32 %v388_v60, 7.0  ;;  %v448_v48 = vmul.f32 %v416_v55, %v2065_v22  ;;  %506 = vst.msk [vmem:[%s1658_s24 + $0x10] sm:$0xf] %vm501_vm5, %v473_v32  ;;  %v2112_v60 = vld [vmem:[#allocation42_spill] sm:$0xff] }
 0x16b   : > { %v392_v18 = vmax.f32 %v2105_v23, -8.0  ;;  %v476_v17 = vpack.c.bf16 %v444_v41, %v444_v41  ;;  %vm2107_vm1 = vnez %v2106_v15  ;;  %v421_v45 = vmin.f32 %v389_v52, 7.0  ;;  %v2113_v55 = vld [vmem:[#allocation2_spill] sm:$0xff]  ;;  %507 = vst.msk [vmem:[%s1658_s24 + $0x14] sm:$0xf] %vm501_vm5, %v474_v27 }
 0x16c   : > { %v2110_v44 = vsel %vm2107_vm1, %v2108_v46, %v2109_v10  ;;  %v449_v57 = vmul.f32 %v417_v33, %v2065_v22  ;;  %v477_v8 = vpack.c.bf16 %v445_v50, %v445_v50  ;;  %vm2111_vm2 = vnez %v2018_v0  ;;  %508 = vst.msk [vmem:[%s1658_s24 + $0x18] sm:$0xf] %vm501_vm5, %v475_v30 }
 0x16d   : > { %v393_v42 = vmax.f32 %v2110_v44, -8.0  ;;  %v2114_v41 = vsel %vm2111_vm2, %v2112_v60, %v2113_v55  ;;  %v422_v36 = vmin.f32 %v390_v59, 7.0  ;;  %v450_v28 = vmul.f32 %v418_v34, %v2065_v22  ;;  %509 = vst.msk [vmem:[%s1658_s24 + $0x1c] sm:$0xf] %vm501_vm5, %v476_v17 }
 0x16e   : > { %v394_v37 = vmax.f32 %v2114_v41, -8.0  ;;  %v478_v3 = vpack.c.bf16 %v446_v63, %v446_v63  ;;  %vm2115_vm3 = vnez %v2020_v49  ;;  %v423_v50 = vmin.f32 %v391_v61, 7.0  ;;  %v2121_v61 = vld [vmem:[#allocation3_spill] sm:$0xff]  ;;  %510 = vst.msk [vmem:[%s1658_s24 + $0x20] sm:$0xf] %vm501_vm5, %v477_v8 }
 0x16f   : > { %v2116_v52 = vsel %vm2115_vm3, %v1464_v13, %v1136_v38  ;;  %v451_v0 = vmul.f32 %v419_v6, %v2065_v22  ;;  %v479_v32 = vpack.c.bf16 %v447_v58, %v447_v58  ;;  %v2118_v34 = vsel %vm1451_vm9, %v1474_v7, %v1139_v47  ;;  %v2120_v38 = vld [vmem:[#allocation44_spill] sm:$0xff] }
 0x170   : > { %v395_v33 = vmax.f32 %v2116_v52, -8.0  ;;  %v396_v63 = vmax.f32 %v2118_v34, -8.0  ;;  %v424_v27 = vmin.f32 %v392_v18, 7.0  ;;  %v452_v49 = vmul.f32 %v420_v31, %v2065_v22  ;;  %v2124_v47 = vld [vmem:[#allocation4_spill] sm:$0xff]  ;;  %511 = vst.msk [vmem:[%s1658_s24 + $0x24] sm:$0xf] %vm501_vm5, %v478_v3 }
 0x171   : > { %v480_v24 = vpack.c.bf16 %v448_v48, %v448_v48  ;;  %v2122_v6 = vsel %vm1469_vm10, %v2120_v38, %v2121_v61  ;;  %v425_v30 = vmin.f32 %v393_v42, 7.0  ;;  %v453_v43 = vmul.f32 %v421_v45, %v2065_v22  ;;  %512 = vst.msk [vmem:[%s1658_s24 + $0x28] sm:$0xf] %vm501_vm5, %v479_v32 }
 0x172   : > { %v397_v58 = vmax.f32 %v2122_v6, -8.0  ;;  %v481_v23 = vpack.c.bf16 %v449_v57, %v449_v57  ;;  %vm2123_vm9 = vnez %v2030_v21  ;;  %v426_v31 = vmin.f32 %v394_v37, 7.0 }
 0x173   : > { %v2125_v7 = vsel %vm2123_vm9, %v1494_v12, %v2124_v47  ;;  %v454_v48 = vmul.f32 %v422_v36, %v2065_v22  ;;  %v482_v17 = vpack.c.bf16 %v450_v28, %v450_v28  ;;  %v399_v15 = vmax.f32 %v818_v26, -8.0  ;;  %513 = vst.msk [vmem:[%s1658_s24 + $0x2c] sm:$0xf] %vm501_vm5, %v480_v24 }
 0x174   : > { %v398_v18 = vmax.f32 %v2125_v7, -8.0  ;;  %v427_v46 = vmin.f32 %v395_v33, 7.0  ;;  %v455_v21 = vmul.f32 %v423_v50, %v2065_v22  ;;  %v483_v10 = vpack.c.bf16 %v451_v0, %v451_v0  ;;  %514 = vst.msk [vmem:[%s1658_s24 + $0x30] sm:$0xf] %vm501_vm5, %v481_v23 }
 0x175   : > { %v400_v12 = vmax.f32 %v826_v40, -8.0  ;;  %v428_v44 = vmin.f32 %v396_v63, 7.0  ;;  %v456_v1 = vmul.f32 %v424_v27, %v2065_v22  ;;  %v484_v42 = vpack.c.bf16 %v452_v49, %v452_v49  ;;  %515 = vst.msk [vmem:[%s1658_s24 + $0x34] sm:$0xf] %vm501_vm5, %v482_v17 }
 0x176   : > { %v2126_v53 = vsel %vm1516_vm6, %v1551_v4, %v1156_v51  ;;  %v429_v26 = vmin.f32 %v397_v58, 7.0  ;;  %v457_v14 = vmul.f32 %v425_v30, %v2065_v22  ;;  %v485_v45 = vpack.c.bf16 %v453_v43, %v453_v43  ;;  %516 = vst.msk [vmem:[%s1658_s24 + $0x38] sm:$0xf] %vm501_vm5, %v483_v10 }
 0x177   : > { %v401_v5 = vmax.f32 %v2126_v53, -8.0  ;;  %v2127_v20 = vsel %vm1541_vm11, %v1553_v16, %v1159_v54  ;;  %v430_v40 = vmin.f32 %v398_v18, 7.0  ;;  %v458_v19 = vmul.f32 %v426_v31, %v2065_v22  ;;  %517 = vst.msk [vmem:[%s1658_s24 + $0x3c] sm:$0xf] %vm501_vm5, %v484_v42 }
 0x178   : > { %v402_v39 = vmax.f32 %v2127_v20, -8.0  ;;  %v486_v57 = vpack.c.bf16 %v454_v48, %v454_v48  ;;  %v2128_v51 = vsel %vm1565_vm12, %v1578_v11, %v1164_v56  ;;  %v431_v8 = vmin.f32 %v399_v15, 7.0  ;;  %518 = vst.msk [vmem:[%s1658_s24 + $0x40] sm:$0xf] %vm501_vm5, %v485_v45 }
 0x179   : > { %v403_v4 = vmax.f32 %v2128_v51, -8.0  ;;  %v459_v2 = vmul.f32 %v427_v46, %v2065_v22  ;;  %v487_v60 = vpack.c.bf16 %v455_v21, %v455_v21  ;;  %v404_v54 = vmax.f32 %v858_v29, -8.0 }
 0x17a   : > { %v432_v16 = vmin.f32 %v400_v12, 7.0  ;;  %v460_v35 = vmul.f32 %v428_v44, %v2065_v22  ;;  %v488_v55 = vpack.c.bf16 %v456_v1, %v456_v1  ;;  %v433_v56 = vmin.f32 %v401_v5, 7.0  ;;  %519 = vst.msk [vmem:[%s1658_s24 + $0x44] sm:$0xf] %vm501_vm5, %v486_v57 }
 0x17b   : > { %v461_v11 = vmul.f32 %v429_v26, %v2065_v22  ;;  %v489_v41 = vpack.c.bf16 %v457_v14, %v457_v14  ;;  %v434_v25 = vmin.f32 %v402_v39, 7.0  ;;  %v462_v37 = vmul.f32 %v430_v40, %v2065_v22  ;;  %520 = vst.msk [vmem:[%s1658_s24 + $0x48] sm:$0xf] %vm501_vm5, %v487_v60 }
 0x17c   : > { %v490_v9 = vpack.c.bf16 %v458_v19, %v458_v19  ;;  %v435_v62 = vmin.f32 %v403_v4, 7.0  ;;  %v463_v29 = vmul.f32 %v431_v8, %v2065_v22  ;;  %v491_v36 = vpack.c.bf16 %v459_v2, %v459_v2  ;;  %521 = vst.msk [vmem:[%s1658_s24 + $0x4c] sm:$0xf] %vm501_vm5, %v488_v55 }
 0x17d   : > { %v436_v28 = vmin.f32 %v404_v54, 7.0  ;;  %v464_v3 = vmul.f32 %v432_v16, %v2065_v22  ;;  %v492_v52 = vpack.c.bf16 %v460_v35, %v460_v35  ;;  %v465_v33 = vmul.f32 %v433_v56, %v2065_v22  ;;  %522 = vst.msk [vmem:[%s1658_s24 + $0x50] sm:$0xf] %vm501_vm5, %v489_v41 }
 0x17e   : > { %v493_v50 = vpack.c.bf16 %v461_v11, %v461_v11  ;;  %v466_v0 = vmul.f32 %v434_v25, %v2065_v22  ;;  %v494_v32 = vpack.c.bf16 %v462_v37, %v462_v37  ;;  %523 = vst.msk [vmem:[%s1658_s24 + $0x54] sm:$0xf] %vm501_vm5, %v490_v9  ;;  %v467_v59 = vmul.f32 %v435_v62, %v2065_v22 }
 0x17f   : > { %v495_v34 = vpack.c.bf16 %v463_v29, %v463_v29  ;;  %524 = vst.msk [vmem:[%s1658_s24 + $0x58] sm:$0xf] %vm501_vm5, %v491_v36  ;;  %v468_v63 = vmul.f32 %v436_v28, %v2065_v22  ;;  %v496_v27 = vpack.c.bf16 %v464_v3, %v464_v3  ;;  %v497_v49 = vpack.c.bf16 %v465_v33, %v465_v33 }
 0x180   : > { %525 = vst.msk [vmem:[%s1658_s24 + $0x5c] sm:$0xf] %vm501_vm5, %v492_v52  ;;  %v498_v24 = vpack.c.bf16 %v466_v0, %v466_v0  ;;  %v499_v13 = vpack.c.bf16 %v467_v59, %v467_v59 }
 0x181   : > { %526 = vst.msk [vmem:[%s1658_s24 + $0x60] sm:$0xf] %vm501_vm5, %v493_v50  ;;  %v500_v38 = vpack.c.bf16 %v468_v63, %v468_v63 }
 0x182   : > { %527 = vst.msk [vmem:[%s1658_s24 + $0x64] sm:$0xf] %vm501_vm5, %v494_v32 }
 0x183   : > { %528 = vst.msk [vmem:[%s1658_s24 + $0x68] sm:$0xf] %vm501_vm5, %v495_v34 }
 0x184   : > { %529 = vst.msk [vmem:[%s1658_s24 + $0x6c] sm:$0xf] %vm501_vm5, %v496_v27 }
 0x185   : > { %530 = vst.msk [vmem:[%s1658_s24 + $0x70] sm:$0xf] %vm501_vm5, %v497_v49 }
 0x186   : > { %531 = vst.msk [vmem:[%s1658_s24 + $0x74] sm:$0xf] %vm501_vm5, %v498_v24 }
 0x187   : > { %532 = vst.msk [vmem:[%s1658_s24 + $0x78] sm:$0xf] %vm501_vm5, %v499_v13 }
 0x188   : > { %533 = vst.msk [vmem:[%s1658_s24 + $0x7c] sm:$0xf] %vm501_vm5, %v500_v38 }
 0x189 PF: > { %s11_s6 = sadd.s32 1, %s875_s6  }
 0x18a   : > { %p8_p4 = scmp.ge.s32.totalorder %s11_s6, 5  }
 0x18c   :  { %10 = sbr.rel (!%p8_p4) target bundleno = 1 (0x1), region = 54 }

</bundles_post_ra>
